<compile_context>
chip_gen: v6e
topology: v6e:2x2x1
jax: 0.10.0
libtpu: 0.0.40
codegen_flags: <defaults>
</compile_context>

<pallas_src>
import functools

import jax
import jax.numpy as jnp
from jax.experimental import pallas as pl
from jax.experimental.pallas import tpu as pltpu


def _round_up(a, b):
    return ((a + b - 1) // b) * b


_TILE_CAP = 1024  # rows per grid step; x+out DMA ≈ 0.1 MiB/step at state_dim=32


def _choose_batch_tiling(batch, cap=_TILE_CAP):
    """Return (batch_tile, padded_batch).

    * tile is a multiple of 8 (sublanes) and ≤ cap,
    * padding waste is < 8 rows per grid step (not "pad to a multiple of cap"),
    * multi-tile grids have even length so v7x's two TensorCores stay balanced
      (dimension_semantics=("parallel",) shards grid steps across them);
      harmless on single-TC v5e/v6e.
    """
    b8 = _round_up(max(batch, 1), 8)
    if b8 <= cap:
        return b8, b8                      # single grid step
    n = -(-b8 // cap)                      # ceil-div
    if n % 2:
        n += 1                             # even grid length for v7x's 2 TCs
    tile = _round_up(-(-b8 // n), 8)
    return tile, tile * n


def policy_kernel(x_ref, w1_ref, b1_ref, w2_ref, b2_ref, out_ref, *, action_dim):
    # x_ref: (TB, S) bf16, w1: (S, H) bf16, b1: (1, H) f32,
    # w2: (H, A_pad) bf16, b2: (1, A_pad) f32 (padded lanes hold -1e30),
    # out: (TB, action_dim) f32.
    x = x_ref[...]

    # fc1 + ReLU (MXU bf16 -> f32 accumulate, elementwise in f32).
    h = jnp.dot(x, w1_ref[...], preferred_element_type=jnp.float32)      # (TB, H)
    h = jnp.maximum(h + b1_ref[...], 0.0)

    # fc2 (feed bf16 back to the MXU, accumulate in f32).  Padded w2 columns
    # are zero and padded b2 lanes are -1e30, so padded logits are -1e30 and
    # no in-kernel mask is needed.
    logits = jnp.dot(h.astype(w2_ref.dtype), w2_ref[...],
                     preferred_element_type=jnp.float32) + b2_ref[...]   # (TB, A_pad)

    # Numerically-stable softmax along the last axis; exact divide so each row
    # sums to 1 (policy-gradient safe).
    m = jnp.max(logits, axis=-1, keepdims=True)
    e = jnp.exp(logits - m)
    denom = jnp.sum(e, axis=-1, keepdims=True)
    probs = e / denom

    # Narrow store: only the real action lanes go back to HBM.
    out_ref[...] = probs[:, :action_dim].astype(out_ref.dtype)


def policy_network_forward(x, w1, b1, w2, b2, *, batch_tile=None):
    batch, state_dim = x.shape
    hidden = w1.shape[1]
    action_dim = w2.shape[1]

    if batch_tile is None:
        tb, b_pad = _choose_batch_tiling(batch)
    else:
        tb = _round_up(batch_tile, 8)
        b_pad = _round_up(batch, tb)
    a_pad = _round_up(action_dim, 128)   # lane-dense fc2 matmul

    # Host-side padding / casting (one-time layout plumbing).
    x_b = x.astype(jnp.bfloat16)
    if b_pad == batch:
        x_p = x_b
    else:
        x_p = jnp.zeros((b_pad, state_dim), jnp.bfloat16).at[:batch].set(x_b)
    w1_b = w1.astype(jnp.bfloat16)
    w2_p = jnp.zeros((hidden, a_pad), jnp.bfloat16).at[:, :action_dim].set(
        w2.astype(jnp.bfloat16))
    b1_p = b1.reshape(1, hidden).astype(jnp.float32)
    # Fold the softmax pad-mask into b2: padded logits == b2 == -1e30.
    b2_p = jnp.full((1, a_pad), -1e30, jnp.float32).at[:, :action_dim].set(
        b2.reshape(1, action_dim).astype(jnp.float32))

    grid = (b_pad // tb,)

    flops = 2 * b_pad * (state_dim * hidden + hidden * a_pad)
    transcendentals = b_pad * a_pad                       # exp per logit lane
    bytes_accessed = (x_p.size * 2 + w1_b.size * 2 + w2_p.size * 2
                      + b1_p.size * 4 + b2_p.size * 4
                      + b_pad * action_dim * 4)           # narrow output writeback

    out = pl.pallas_call(
        functools.partial(policy_kernel, action_dim=action_dim),
        out_shape=jax.ShapeDtypeStruct((b_pad, action_dim), jnp.float32),
        grid=grid,
        in_specs=[
            pl.BlockSpec((tb, state_dim), lambda i: (i, 0)),      # x: tiled over batch
            # Grid-invariant weights/biases: index never changes, so Pallas
            # DMAs them once and keeps them resident across grid steps.
            pl.BlockSpec((state_dim, hidden), lambda i: (0, 0)),
            pl.BlockSpec((1, hidden), lambda i: (0, 0)),
            pl.BlockSpec((hidden, a_pad), lambda i: (0, 0)),
            pl.BlockSpec((1, a_pad), lambda i: (0, 0)),
        ],
        out_specs=pl.BlockSpec((tb, action_dim), lambda i: (i, 0)),
        compiler_params=pltpu.CompilerParams(
            dimension_semantics=("parallel",)),
        cost_estimate=pl.CostEstimate(
            flops=flops, transcendentals=transcendentals,
            bytes_accessed=bytes_accessed),
    )(x_p, w1_b, b1_p, w2_p, b2_p)

    # Only slice when batch padding was actually added (avoids an extra
    # HBM round-trip on already-aligned large batches).
    return out if b_pad == batch else out[:batch]


def init_params(key, state_dim, action_dim, hidden=128):
    # Deterministic synthetic init (uniform, similar scale to torch default).
    k1, k2, k3, k4 = jax.random.split(key, 4)
    lim1 = 1.0 / jnp.sqrt(state_dim)
    lim2 = 1.0 / jnp.sqrt(hidden)
    w1 = jax.random.uniform(k1, (state_dim, hidden), jnp.float32, -lim1, lim1)
    b1 = jax.random.uniform(k2, (1, hidden), jnp.float32, -lim1, lim1)
    w2 = jax.random.uniform(k3, (hidden, action_dim), jnp.float32, -lim2, lim2)
    b2 = jax.random.uniform(k4, (1, action_dim), jnp.float32, -lim2, lim2)
    return w1, b1, w2, b2


if __name__ == "__main__":
    state_dim = 32
    action_dim = 8
    batch = 2

    key = jax.random.PRNGKey(0)
    kx, kp = jax.random.split(key)
    x = jax.random.normal(kx, (batch, state_dim), jnp.float32)
    w1, b1, w2, b2 = init_params(kp, state_dim, action_dim)

    out = jax.block_until_ready(policy_network_forward(x, w1, b1, w2, b2))

    # Reference in plain JAX with the same bf16 MXU-operand casts / f32 accumulation.
    xb, w1b, w2b = (a.astype(jnp.bfloat16) for a in (x, w1, w2))
    h_ref = jnp.maximum(jnp.dot(xb, w1b, preferred_element_type=jnp.float32) + b1, 0.0)
    logits_ref = jnp.dot(h_ref.astype(jnp.bfloat16), w2b,
                         preferred_element_type=jnp.float32) + b2
    ref = jax.nn.softmax(logits_ref, axis=-1)

    assert out.shape == (batch, action_dim)
    assert jnp.allclose(out, ref, atol=2e-3, rtol=2e-3), float(jnp.max(jnp.abs(out - ref)))
    assert jnp.allclose(jnp.sum(out, axis=-1), 1.0, atol=1e-5)

    print("KERNEL_OK")
</pallas_src>

<mosaic_0001>
module attributes {stable_mosaic.version = 11 : i64} {
  func.func @policy_kernel(%arg0: i32, %arg1: memref<8x32xbf16, #tpu.memory_space<vmem>>, %arg2: memref<32x128xbf16, #tpu.memory_space<vmem>>, %arg3: memref<1x128xf32, #tpu.memory_space<vmem>>, %arg4: memref<128x128xbf16, #tpu.memory_space<vmem>>, %arg5: memref<1x128xf32, #tpu.memory_space<vmem>>, %arg6: memref<8x8xf32, #tpu.memory_space<vmem>>) attributes {dimension_semantics = [#tpu.dimension_semantics<parallel>], iteration_bounds = array<i64: 1>, scalar_prefetch = 0 : i64, scratch_operands = 0 : i64, tpu.core_type = #tpu.core_type<tc>, window_params = [{transform_indices = @transform_0, window_bounds = array<i64: 8, 32>}, {pipeline_mode = #tpu.pipeline_mode<synchronous>, transform_indices = @transform_1, window_bounds = array<i64: 32, 128>}, {pipeline_mode = #tpu.pipeline_mode<synchronous>, transform_indices = @transform_2, window_bounds = array<i64: 1, 128>}, {pipeline_mode = #tpu.pipeline_mode<synchronous>, transform_indices = @transform_3, window_bounds = array<i64: 128, 128>}, {pipeline_mode = #tpu.pipeline_mode<synchronous>, transform_indices = @transform_4, window_bounds = array<i64: 1, 128>}, {transform_indices = @transform_5, window_bounds = array<i64: 8, 8>}]} {
    %c0 = arith.constant 0 : index
    %c0_0 = arith.constant 0 : index
    %0 = vector.load %arg1[%c0, %c0_0] : memref<8x32xbf16, #tpu.memory_space<vmem>>, vector<8x32xbf16>
    %c0_1 = arith.constant 0 : index
    %c0_2 = arith.constant 0 : index
    %1 = vector.load %arg2[%c0_1, %c0_2] : memref<32x128xbf16, #tpu.memory_space<vmem>>, vector<32x128xbf16>
    %cst = arith.constant dense<0.000000e+00> : vector<8x128xf32>
    %2 = tpu.matmul %0, %1, %cst {dimension_numbers = #tpu.dot_dimension_numbers<[1], [0], [0], [1], [0, 0, 1, 1], [], []>} : vector<8x32xbf16>, vector<32x128xbf16>, vector<8x128xf32> -> vector<8x128xf32>
    %c0_3 = arith.constant 0 : index
    %c0_4 = arith.constant 0 : index
    %3 = vector.load %arg3[%c0_3, %c0_4] : memref<1x128xf32, #tpu.memory_space<vmem>>, vector<1x128xf32>
    %4 = vector.broadcast %3 : vector<1x128xf32> to vector<8x128xf32>
    %5 = arith.addf %2, %4 : vector<8x128xf32>
    %cst_5 = arith.constant 0.000000e+00 : f32
    %6 = vector.broadcast %cst_5 : f32 to vector<8x128xf32>
    %7 = arith.maximumf %5, %6 : vector<8x128xf32>
    %8 = arith.truncf %7 : vector<8x128xf32> to vector<8x128xbf16>
    %c0_6 = arith.constant 0 : index
    %c0_7 = arith.constant 0 : index
    %9 = vector.load %arg4[%c0_6, %c0_7] : memref<128x128xbf16, #tpu.memory_space<vmem>>, vector<128x128xbf16>
    %cst_8 = arith.constant dense<0.000000e+00> : vector<8x128xf32>
    %10 = tpu.matmul %8, %9, %cst_8 {dimension_numbers = #tpu.dot_dimension_numbers<[1], [0], [0], [1], [0, 0, 1, 1], [], []>} : vector<8x128xbf16>, vector<128x128xbf16>, vector<8x128xf32> -> vector<8x128xf32>
    %c0_9 = arith.constant 0 : index
    %c0_10 = arith.constant 0 : index
    %11 = vector.load %arg5[%c0_9, %c0_10] : memref<1x128xf32, #tpu.memory_space<vmem>>, vector<1x128xf32>
    %12 = vector.broadcast %11 : vector<1x128xf32> to vector<8x128xf32>
    %13 = arith.addf %10, %12 : vector<8x128xf32>
    %cst_11 = arith.constant dense<0xFF800000> : vector<8xf32>
    %14 = vector.multi_reduction <maximumf>, %13, %cst_11 [1] : vector<8x128xf32> to vector<8xf32>
    %15 = vector.shape_cast %14 : vector<8xf32> to vector<8x1xf32>
    %16 = vector.broadcast %15 : vector<8x1xf32> to vector<8x128xf32>
    %17 = arith.subf %13, %16 : vector<8x128xf32>
    %18 = math.exp %17 : vector<8x128xf32>
    %cst_12 = arith.constant dense<0.000000e+00> : vector<8xf32>
    %19 = vector.multi_reduction <add>, %18, %cst_12 [1] : vector<8x128xf32> to vector<8xf32>
    %20 = vector.shape_cast %19 : vector<8xf32> to vector<8x1xf32>
    %21 = vector.broadcast %20 : vector<8x1xf32> to vector<8x128xf32>
    %22 = arith.divf %18, %21 : vector<8x128xf32>
    %23 = vector.extract_strided_slice %22 {offsets = [0, 0], sizes = [8, 8], strides = [1, 1]} : vector<8x128xf32> to vector<8x8xf32>
    %c0_13 = arith.constant 0 : index
    %c0_14 = arith.constant 0 : index
    %24 = vector.load %arg6[%c0_13, %c0_14] : memref<8x8xf32, #tpu.memory_space<vmem>>, vector<8x8xf32>
    tpu.vector_store %arg6[%c0_13, %c0_14], %23 {strides = array<i32>} : memref<8x8xf32, #tpu.memory_space<vmem>>, vector<8x8xf32>,
    return
  }
  func.func @transform_0(%arg0: i32) -> (i32, i32) {
    %c0_i32 = arith.constant 0 : i32
    %c0_i32_0 = arith.constant 0 : i32
    return %arg0, %c0_i32 : i32, i32
  }
  func.func @transform_1(%arg0: i32) -> (i32, i32) {
    %c0_i32 = arith.constant 0 : i32
    %c0_i32_0 = arith.constant 0 : i32
    %c0_i32_1 = arith.constant 0 : i32
    return %c0_i32, %c0_i32_0 : i32, i32
  }
  func.func @transform_2(%arg0: i32) -> (i32, i32) {
    %c0_i32 = arith.constant 0 : i32
    %c0_i32_0 = arith.constant 0 : i32
    %c0_i32_1 = arith.constant 0 : i32
    return %c0_i32, %c0_i32_0 : i32, i32
  }
  func.func @transform_3(%arg0: i32) -> (i32, i32) {
    %c0_i32 = arith.constant 0 : i32
    %c0_i32_0 = arith.constant 0 : i32
    %c0_i32_1 = arith.constant 0 : i32
    return %c0_i32, %c0_i32_0 : i32, i32
  }
  func.func @transform_4(%arg0: i32) -> (i32, i32) {
    %c0_i32 = arith.constant 0 : i32
    %c0_i32_0 = arith.constant 0 : i32
    %c0_i32_1 = arith.constant 0 : i32
    return %c0_i32, %c0_i32_0 : i32, i32
  }
  func.func @transform_5(%arg0: i32) -> (i32, i32) {
    %c0_i32 = arith.constant 0 : i32
    %c0_i32_0 = arith.constant 0 : i32
    return %arg0, %c0_i32 : i32, i32
  }
}

</mosaic_0001>

<bundles_post_ra>
// kernel: tpu_custom_call.1
= control target key start
LH: loop header
LB: loop body
LE: loop exit
PB: predicated region body
PF: predicated region fallthrough
CT: control target
= control target key end

     0   :  { %10 = vsyncpa [#allocation3], 0  ;;  %s486_s0 = inlined_call_operand.hbm [shape: bf16[8,32], index: 0, kind: input, shape index: {}]   ;;  %s487_s1 = inlined_call_operand.hbm [shape: bf16[32,128], index: 1, kind: input, shape index: {}]   ;;  %s488_s2 = inlined_call_operand.vmem [shape: f32[1,128], index: 2, kind: input, shape index: {}]   ;;  %s489_s3 = inlined_call_operand.hbm [shape: bf16[128,128], index: 3, kind: input, shape index: {}]   ;;  %s490_s4 = inlined_call_operand.vmem [shape: f32[1,128], index: 4, kind: input, shape index: {}]   ;;  %s491_s5 = inlined_call_operand.hbm [shape: f32[8,8], index: 5, kind: output, shape index: {}]  }
   0x1   :  { %11 = vsyncpa [#allocation6], 0 }
   0x2   :  { %12 = vsyncpa [#allocation4], 0  ;;  %s430_s18 = smov [#allocation5]  }
   0x3   :  { %s28_s19 = sshll.u32 %s430_s18, 4  ;;  %s29_s19 = int_to_ptr.vmem [resolvable:$true] %s28_s19 }
   0x4   :  { %s352_s20 = scalar_lea.vmem %s29_s19, 256  ;;  %p357_p1 = scmp.lt.s32.totalorder %s29_s19, %s29_s19 }
   0x5   :  { %p353_p0 = scmp.ne.s32.totalorder %s29_s19, %s352_s20  ;;  %p358_p2 = scmp.lt.s32.totalorder %s352_s20, %s352_s20 }
   0x7   :  { %p359_p3 = por %p358_p2, %p357_p1 }
   0x9   :  { %p360_p4 = pnand %p359_p3, %p353_p0 }
   0xb   :  { %363 = shalt.err (!%p360_p4)
}
   0xc   :  { %s431_s21 = smov 64   ;;  %s432_s22 = smov 4  }
   0xd   :  { %34 = dma.hbm_to_vmem [thread:$0]  %s487_s1, 256, %s29_s19, [#allocation6], %s431_s21, %s431_s21, %s432_s22  }
   0xe   :  { %s433_s25 = smov [#allocation2]   ;;  %s434_s27 = smov [#allocation7]  }
   0xf   :  { %s19_s26 = sshll.u32 %s433_s25, 4  ;;  %s42_s28 = sshll.u32 %s434_s27, 4  ;;  %s20_s26 = int_to_ptr.vmem [resolvable:$true] %s19_s26  ;;  %s43_s28 = int_to_ptr.vmem [resolvable:$true] %s42_s28 }
  0x10   :  { %s372_s29 = scalar_lea.vmem %s20_s26, 64  ;;  %p377_p6 = scmp.lt.s32.totalorder %s20_s26, %s20_s26 }
  0x11   :  { %p373_p5 = scmp.ne.s32.totalorder %s20_s26, %s372_s29  ;;  %p378_p7 = scmp.lt.s32.totalorder %s372_s29, %s372_s29 }
  0x13   :  { %p379_p8 = por %p378_p7, %p377_p6 }
  0x15   :  { %p380_p9 = pnand %p379_p8, %p373_p5 }
  0x17   :  { %383 = shalt.err (!%p380_p9)
}
  0x18   :  { %22 = dma.hbm_to_vmem [thread:$0]  %s486_s0, 64, %s20_s26, [#allocation3]  }
  0x19   :  { %s392_s7 = scalar_lea.vmem %s43_s28, 1024  ;;  %p397_p11 = scmp.lt.s32.totalorder %s43_s28, %s43_s28 }
  0x1a   :  { %p393_p10 = scmp.ne.s32.totalorder %s43_s28, %s392_s7  ;;  %p398_p12 = scmp.lt.s32.totalorder %s392_s7, %s392_s7 }
  0x1c   :  { %p399_p13 = por %p398_p12, %p397_p11 }
  0x1e   :  { %p400_p0 = pnand %p399_p13, %p393_p10 }
  0x20   :  { %403 = shalt.err (!%p400_p0)
}
  0x21   :  { %48 = dma.hbm_to_vmem [thread:$0]  %s489_s3, 1024, %s43_s28, [#allocation6], %s431_s21, %s431_s21, %s432_s22  }
  0x22   :  { %424 = dma.done.wait [#allocation3], 64  }
  0x23   :  { %425 = vsyncadd [#allocation3], 4294967232 }
  0x24   :  { %426 = dma.done.wait [#allocation6], 1280  }
  0x25   :  { %427 = vsyncadd [#allocation6], 4294966016  ;;  %v435_v0 = vmov 0.0   ;;  %vm436_vm0 = vmmov 0   ;;  %v330_v1 = vld [vmem:[#allocation5 + $0x8] sm:$0xff]   ;;  %v331_v2 = vld [vmem:[#allocation5] sm:$0xff]  }
  0x26   :  { %294 = vmatprep.subr.bf16.mxu0 %v435_v0  ;;  %298 = vmatprep.mubr.msk.bf16.mxu0 %vm436_vm0, %v435_v0  ;;  %v332_v3 = vld [vmem:[#allocation7 + $0x38] sm:$0xff]   ;;  %vm85_vm1 = vcmask 261120   ;;  %v333_v4 = vld [vmem:[#allocation7 + $0x30] sm:$0xff]   ;;  %v61_v5 = vld [vmem:[#allocation2] sm:$0xf]  ;;  %vm251_vm2 = vcmask 64512  }
  0x27   :  { %302 = vmatprep.subr.bf16.mxu1 %v435_v0  ;;  %318 = vmatprep.mubr.msk.bf16.mxu1 %vm436_vm0, %v435_v0  ;;  %v334_v6 = vld [vmem:[#allocation7 + $0x28] sm:$0xff]   ;;  %v335_v7 = vld [vmem:[#allocation7 + $0x20] sm:$0xff]   ;;  %v336_v8 = vld [vmem:[#allocation7 + $0x18] sm:$0xff]  }
  0x28   :  { %295 = vmatpush3.bf16.msra.mxu0 %v330_v1  ;;  %303 = vmatpush3.bf16.msra.mxu1 %v332_v3  ;;  %v337_v9 = vld [vmem:[#allocation7 + $0x10] sm:$0xff]   ;;  %v338_v10 = vld [vmem:[#allocation7 + $0x8] sm:$0xff]   ;;  %v339_v11 = vld [vmem:[#allocation7] sm:$0xff]  }
  0x29   :  { %296 = vmatprep.subr.bf16.mxu0 %v435_v0  ;;  %304 = vmatprep.subr.bf16.mxu1 %v435_v0  ;;  %v269_v12 = vld [vmem:[%s488_s2] ss:$0 sm:$0xff]  ;;  %s437_s2 = smov [#allocation8]  }
  0x2a   :  { %v273_v20 = vld [vmem:[%s490_s4] ss:$0 sm:$0xff]  ;;  %s259_s11 = sshll.u32 %s437_s2, 4  ;;  %s260_s11 = int_to_ptr.vmem [resolvable:$true] %s259_s11 }
  0x2b   :  { %s404_s4 = scalar_lea.vmem %s260_s11, 128  ;;  %p409_p2 = scmp.lt.s32.totalorder %s260_s11, %s260_s11 }
  0x2c   :  { %297 = vmatpush3.bf16.msra.mxu0 %v331_v2  ;;  %305 = vmatpush3.bf16.msra.mxu1 %v333_v4  ;;  %p405_p1 = scmp.ne.s32.totalorder %s260_s11, %s404_s4  ;;  %p410_p3 = scmp.lt.s32.totalorder %s404_s4, %s404_s4 }
  0x2d   :  { %306 = vmatprep.subr.bf16.mxu1 %v435_v0 }
  0x2e   :  { %p411_p4 = por %p410_p3, %p409_p2 }
  0x2f   :  { %299 = vmatmul.mubr.msk.bf16.vlgmr.msra.gmra.mxu0 %vm85_vm1, %v61_v5 }
  0x30   :  { %307 = vmatpush3.bf16.msra.mxu1 %v334_v6  ;;  %p412_p5 = pnand %p411_p4, %p405_p1 }
  0x31   :  { %308 = vmatprep.subr.bf16.mxu1 %v435_v0 }
  0x34   :  { %309 = vmatpush3.bf16.msra.mxu1 %v335_v7 }
  0x35   :  { %310 = vmatprep.subr.bf16.mxu1 %v435_v0 }
  0x38   :  { %311 = vmatpush3.bf16.msra.mxu1 %v336_v8 }
  0x39   :  { %312 = vmatprep.subr.bf16.mxu1 %v435_v0 }
  0x3c   :  { %313 = vmatpush3.bf16.msra.mxu1 %v337_v9 }
  0x3d   :  { %314 = vmatprep.subr.bf16.mxu1 %v435_v0 }
  0x40   :  { %315 = vmatpush3.bf16.msra.mxu1 %v338_v10 }
  0x41   :  { %316 = vmatprep.subr.bf16.mxu1 %v435_v0 }
  0x44   :  { %317 = vmatpush3.bf16.msra.mxu1 %v339_v11 }
  0xef   :  { %v123_v13 = vpop.f32.mrf.mxu0 }
  0xf0   :  { %v124_v14 = vadd.f32 %v269_v12, %v123_v13 }
  0xf1   :  { %v300_v15 = vpop.f32.mrf.mxu0 }
  0xf2   :  { %v129_v16 = vmax.f32 %v124_v14, 0.0 }
  0xf3   :  { %v126_v17 = vpop.f32.mrf.mxu0 }
  0xf4   :  { %v130_v18 = vpack.c.bf16 %v129_v16, %v129_v16 }
  0xf5   :  { %v301_v19 = vpop.f32.mrf.mxu0 }
  0xf6   :  { %319 = vmatmul.mubr.bf16.vlgmr.msra.gmra.mxu1 %v130_v18 }
 0x1b6   :  { %v236_v21 = vpop.f32.mrf.mxu1 }
 0x1b7   :  { %v237_v22 = vadd.f32 %v273_v20, %v236_v21 }
 0x1b8   :  { %v320_v23 = vpop.f32.mrf.mxu1 }
 0x1b9   :  { %242 = vmax.xlane.f32.xlu0 %v237_v22 }
 0x1ba   :  { %v239_v24 = vpop.f32.mrf.mxu1 }
 0x1bc   :  { %v321_v25 = vpop.f32.mrf.mxu1 }
 0x242   :  { %v243_v26 = vpop.xlane.xlu0 %242 }
 0x243   :  { %v244_v27 = vsub.f32 %v237_v22, %v243_v26 }
 0x245   :  { %v245_v28 = vmul.f32 1.442695, %v244_v27 }
 0x247   :  { %340 = vpow2.f32 %v245_v28 }
 0x254   :  { %v341_v29 = vpop.eup %340 }
 0x255   :  { %247 = vadd.xlane.f32.xlu0 %v341_v29 }
 0x2de   :  { %v248_v30 = vpop.xlane.xlu0 %247 }
 0x2df   :  { %342 = vrcp.f32 %v248_v30 }
 0x2ec   :  { %v343_v31 = vpop.eup %342 }
 0x2ed   :  { %v250_v32 = vmul.f32 %v343_v31, %v341_v29 }
 0x2ef   :  { %252 = vst.msk [vmem:[#allocation8] sm:$0xff] %vm251_vm2, %v250_v32 }
 0x2f0   :  { %415 = shalt.err (!%p412_p5)
}
 0x2f1   :  { %262 = dma.vmem_to_hbm [thread:$0]  %s260_s11, 128, %s491_s5, [#allocation4]  }
 0x2f2   :  { %428 = dma.done.wait [#allocation4], 128  }
 0x2f3   :  { %429 = vsyncadd [#allocation4], 4294967168 }
 0x2f4   :  { %266 = vsyncpa [#allocation3], 1 }
 0x2f5   :  { %267 = vsyncpa [#allocation6], 1 }
 0x2f6   :  { %268 = vsyncpa [#allocation4], 1 }

</bundles_post_ra>
